<compile_context>
chip_gen: v5e
topology: v5e:2x2
jax: 0.10.0
libtpu: 0.0.40
codegen_flags: <defaults>
</compile_context>

<pallas_src>
import functools

import jax
import jax.numpy as jnp
from jax.experimental import pallas as pl
from jax.experimental.pallas import tpu as pltpu


def _round_up(x, m):
    return ((x + m - 1) // m) * m


# -----------------------------------------------------------------------------
# Kernel 1: input_proj (1x1 conv) + pos_embed add, channel-major layout.
#   x block   : (C, tile_S)          (straight reshape of NCHW, no transpose)
#   w         : (D, C)               (PyTorch conv weight layout, bf16)
#   bias      : (D, 1) f32
#   pos block : (D, tile_S) f32
#   out block : (D, tile_S) bf16     -> memory is (B, D, S)
# -----------------------------------------------------------------------------
def _input_proj_kernel(x_ref, w_ref, b_ref, pos_ref, o_ref):
    x = x_ref[0].astype(jnp.bfloat16)                       # (C, tS)
    acc = jnp.dot(w_ref[...], x,                            # (D, tS) f32 acc
                  preferred_element_type=jnp.float32)
    o_ref[0] = (acc + b_ref[...] + pos_ref[0]).astype(o_ref.dtype)


def input_proj_pos_embed(x_nchw, w_dc, b_d1, pos_1ds, *, max_tile=512):
    """x: (B, C, H, W) f32.  Returns (memory (B, D, S_pad) bf16, valid S)."""
    B, C, H, W = x_nchw.shape
    D = w_dc.shape[0]
    S = H * W
    x_flat = x_nchw.reshape(B, C, S)                        # free reshape (no transpose)

    tile_s = min(max_tile, _round_up(S, 128))
    S_pad = _round_up(S, tile_s)
    pos = pos_1ds
    if S_pad != S:
        x_flat = jnp.pad(x_flat, ((0, 0), (0, 0), (0, S_pad - S)))
        pos = jnp.pad(pos, ((0, 0), (0, 0), (0, S_pad - S)))

    memory = pl.pallas_call(
        _input_proj_kernel,
        out_shape=jax.ShapeDtypeStruct((B, D, S_pad), jnp.bfloat16),
        grid=(B, S_pad // tile_s),
        in_specs=[
            pl.BlockSpec((1, C, tile_s), lambda b, s: (b, 0, s)),
            pl.BlockSpec((D, C), lambda b, s: (0, 0)),
            pl.BlockSpec((D, 1), lambda b, s: (0, 0)),
            pl.BlockSpec((1, D, tile_s), lambda b, s: (0, 0, s)),
        ],
        out_specs=pl.BlockSpec((1, D, tile_s), lambda b, s: (b, 0, s)),
        compiler_params=pltpu.CompilerParams(
            dimension_semantics=("parallel", "parallel")),
    )(x_flat, w_dc, b_d1, pos)
    return memory, S


# -----------------------------------------------------------------------------
# Kernel 2: fused cross-attention stand-in + prediction heads (per batch).
#   q        : (Q, D) bf16           memory block: (D, S_pad) bf16
#   wcls     : (D, PACK) bf16        [obj_w | verb_w | 0...]
#   wo3/ws3  : (D, PACK) bf16        bbox-MLP final layers placed at their
#                                    packed-column offsets, zero elsewhere
#   bpack    : (1, PACK) f32         all final-layer biases, packed
#   ow1..sb2 : bbox-MLP hidden layers (Linear-ReLU-Linear-ReLU)
#   out      : (Q, PACK) f32 packed slab, sigmoid applied to coord columns only
# -----------------------------------------------------------------------------
def _attn_heads_kernel(q_ref, m_ref,
                       wcls_ref, wo3_ref, ws3_ref, bpack_ref,
                       ow1_ref, ob1_ref, ow2_ref, ob2_ref,
                       sw1_ref, sb1_ref, sw2_ref, sb2_ref,
                       out_ref, *, valid_s, coord_start):
    q = q_ref[...]                                          # (Q, D) bf16
    m = m_ref[0]                                            # (D, S_pad) bf16
    qn, d = q.shape
    s_pad = m.shape[-1]

    # ---- cross-attention stand-in (softmax math in f32, f32 MXU accumulation)
    s = jnp.dot(q, m, preferred_element_type=jnp.float32)   # (Q, S_pad)
    s = s * jnp.float32(1.0 / (d ** 0.5))
    if valid_s < s_pad:                                     # mask padded keys
        col = jax.lax.broadcasted_iota(jnp.int32, (qn, s_pad), 1)
        s = jnp.where(col < valid_s, s, -jnp.inf)
    s = s - jnp.max(s, axis=-1, keepdims=True)
    p = jnp.exp(s)
    p = p * pl.reciprocal(jnp.sum(p, axis=-1, keepdims=True), approx=True)

    # h = p @ m.T (contract the S axis of both)  -> (Q, D)
    h = jax.lax.dot_general(p.astype(jnp.bfloat16), m,
                            (((1,), (1,)), ((), ())),
                            preferred_element_type=jnp.float32)
    hb = h.astype(jnp.bfloat16)

    # ---- bbox-MLP hidden stacks: Linear-ReLU-Linear-ReLU (final layer folded
    #      into the 128-wide packed matmul below)
    def hidden2(w1, b1, w2, b2):
        x = jnp.dot(hb, w1[...], preferred_element_type=jnp.float32) + b1[...]
        x = jnp.maximum(x, 0.0).astype(jnp.bfloat16)
        x = jnp.dot(x, w2[...], preferred_element_type=jnp.float32) + b2[...]
        return jnp.maximum(x, 0.0).astype(jnp.bfloat16)

    xo = hidden2(ow1_ref, ob1_ref, ow2_ref, ob2_ref)        # (Q, D)
    xs = hidden2(sw1_ref, sb1_ref, sw2_ref, sb2_ref)        # (Q, D)

    # ---- all final projections land directly in the 128-wide packed slab
    pre = (jnp.dot(hb, wcls_ref[...], preferred_element_type=jnp.float32)
           + jnp.dot(xo, wo3_ref[...], preferred_element_type=jnp.float32)
           + jnp.dot(xs, ws3_ref[...], preferred_element_type=jnp.float32)
           + bpack_ref[...])                                # (Q, PACK) f32

    col = jax.lax.broadcasted_iota(jnp.int32, pre.shape, 1)
    is_coord = jnp.logical_and(col >= coord_start, col < coord_start + 8)
    out_ref[0] = jnp.where(is_coord, jax.nn.sigmoid(pre), pre)


# -----------------------------------------------------------------------------
# Full ATTHOI.forward (HOI branch).
# -----------------------------------------------------------------------------
@jax.jit
def _atthoi_forward_arrays(params, samples):
    src = samples                                           # (B, C, H, W) NCHW
    B = src.shape[0]
    D = params["input_proj_w"].shape[0]
    Q = params["query_embed"].shape[0]
    O = params["obj_b"].shape[1]                            # num_obj_classes + 1
    V = params["verb_b"].shape[1]                           # num_verb_classes
    PACK = _round_up(O + V + 8, 128)
    bf16, f32 = jnp.bfloat16, jnp.float32

    # Kernel 1: 1x1 conv + pos_embed  -> memory (B, D, S_pad) bf16
    memory, valid_s = input_proj_pos_embed(
        src, params["input_proj_w"], params["input_proj_b"], params["pos_embed"])
    S_pad = memory.shape[2]

    # Pack the final projection weights into 128-wide (lane-dense) matrices.
    w_cls_pack = jnp.concatenate(
        [params["obj_w"], params["verb_w"],
         jnp.zeros((D, PACK - O - V), bf16)], axis=1)
    w_o3_pack = jnp.concatenate(
        [jnp.zeros((D, O + V), bf16), params["obj_mlp_w3"],
         jnp.zeros((D, PACK - O - V - 4), bf16)], axis=1)
    w_s3_pack = jnp.concatenate(
        [jnp.zeros((D, O + V + 4), bf16), params["sub_mlp_w3"],
         jnp.zeros((D, PACK - O - V - 8), bf16)], axis=1)
    b_pack = jnp.concatenate(
        [params["obj_b"], params["verb_b"], params["obj_mlp_b3"],
         params["sub_mlp_b3"], jnp.zeros((1, PACK - O - V - 8), f32)], axis=1)

    # Kernel 2: fused attention + heads, one parallel grid step per batch.
    packed = pl.pallas_call(
        functools.partial(_attn_heads_kernel,
                          valid_s=valid_s, coord_start=O + V),
        out_shape=jax.ShapeDtypeStruct((B, Q, PACK), f32),
        grid=(B,),
        in_specs=[
            pl.BlockSpec((Q, D), lambda b: (0, 0)),
            pl.BlockSpec((1, D, S_pad), lambda b: (b, 0, 0)),
            pl.BlockSpec((D, PACK), lambda b: (0, 0)),
            pl.BlockSpec((D, PACK), lambda b: (0, 0)),
            pl.BlockSpec((D, PACK), lambda b: (0, 0)),
            pl.BlockSpec((1, PACK), lambda b: (0, 0)),
            pl.BlockSpec((D, D), lambda b: (0, 0)),
            pl.BlockSpec((1, D), lambda b: (0, 0)),
            pl.BlockSpec((D, D), lambda b: (0, 0)),
            pl.BlockSpec((1, D), lambda b: (0, 0)),
            pl.BlockSpec((D, D), lambda b: (0, 0)),
            pl.BlockSpec((1, D), lambda b: (0, 0)),
            pl.BlockSpec((D, D), lambda b: (0, 0)),
            pl.BlockSpec((1, D), lambda b: (0, 0)),
        ],
        out_specs=pl.BlockSpec((1, Q, PACK), lambda b: (b, 0, 0)),
        compiler_params=pltpu.CompilerParams(
            dimension_semantics=("parallel",)),
    )(params["query_embed"], memory,
      w_cls_pack, w_o3_pack, w_s3_pack, b_pack,
      params["obj_mlp_w1"], params["obj_mlp_b1"],
      params["obj_mlp_w2"], params["obj_mlp_b2"],
      params["sub_mlp_w1"], params["sub_mlp_b1"],
      params["sub_mlp_w2"], params["sub_mlp_b2"])

    # Unpack the lane-dense slab.  These are the [-1] (last decoder layer)
    # outputs; aux_loss outputs are not produced (aux_loss=False).
    obj_logits = packed[..., :O]
    verb_logits = packed[..., O:O + V]
    obj_coord = packed[..., O + V:O + V + 4]
    sub_coord = packed[..., O + V + 4:O + V + 8]
    return obj_logits, verb_logits, obj_coord, sub_coord


def atthoi_forward(params, samples, dtype="hoi", dataset="vcoco"):
    assert dtype == "hoi" and dataset in ("vcoco", "hico")
    # TODO(synk): single verb head stands in for vcoco/hico verb class embeds.
    obj_logits, verb_logits, obj_coord, sub_coord = _atthoi_forward_arrays(
        params, samples)
    return {
        "pred_obj_logits": obj_logits,
        "pred_logits": verb_logits,
        "pred_obj_boxes": obj_coord,
        "pred_sub_boxes": sub_coord,
        "type": dtype,
        "dataset": dataset,
    }


# -----------------------------------------------------------------------------
# Deterministic parameter construction (shapes from ATTHOI.__init__ / MLP).
# Matmul weights are stored in bf16 (MXU operands); biases / pos in f32.
# -----------------------------------------------------------------------------
def make_params(key, *, c_in, hidden_dim, num_queries, num_obj_classes,
                num_verb_classes, spatial):
    D = hidden_dim
    S = spatial
    keys = jax.random.split(key, 20)
    scale = 0.05
    bf16, f32 = jnp.bfloat16, jnp.float32

    def w(k, shape, dt):
        return (scale * jax.random.normal(k, shape)).astype(dt)

    return {
        # input_proj: Conv2d(c_in, D, kernel 1); weight in PyTorch (out, in) layout
        "input_proj_w": w(keys[0], (D, c_in), bf16),
        "input_proj_b": w(keys[1], (D, 1), f32),
        # query_embed: nn.Embedding(num_queries, D).weight
        "query_embed": w(keys[2], (num_queries, D), bf16),
        # deterministic stand-in positional embedding (channel-major (1, D, S))
        "pos_embed": w(keys[3], (1, D, S), f32),
        # obj_class_embed: Linear(D, num_obj_classes + 1)
        "obj_w": w(keys[4], (D, num_obj_classes + 1), bf16),
        "obj_b": w(keys[5], (1, num_obj_classes + 1), f32),
        # verb_class_embed (vcoco/hico): Linear(D, num_verb_classes)
        "verb_w": w(keys[6], (D, num_verb_classes), bf16),
        "verb_b": w(keys[7], (1, num_verb_classes), f32),
        # obj_bbox_embed: MLP(D, D, 4, 3)
        "obj_mlp_w1": w(keys[8], (D, D), bf16),  "obj_mlp_b1": w(keys[9], (1, D), f32),
        "obj_mlp_w2": w(keys[10], (D, D), bf16), "obj_mlp_b2": w(keys[11], (1, D), f32),
        "obj_mlp_w3": w(keys[12], (D, 4), bf16), "obj_mlp_b3": w(keys[13], (1, 4), f32),
        # sub_bbox_embed: MLP(D, D, 4, 3)
        "sub_mlp_w1": w(keys[14], (D, D), bf16), "sub_mlp_b1": w(keys[15], (1, D), f32),
        "sub_mlp_w2": w(keys[16], (D, D), bf16), "sub_mlp_b2": w(keys[17], (1, D), f32),
        "sub_mlp_w3": w(keys[18], (D, 4), bf16), "sub_mlp_b3": w(keys[19], (1, 4), f32),
    }


if __name__ == "__main__":
    key = jax.random.PRNGKey(0)
    k_x, k_p = jax.random.split(key)

    B, C_in, H, W = 2, 4, 16, 16
    hidden_dim = 32
    num_queries = 8
    num_obj_classes = 7      # head outputs num_obj_classes + 1 = 8
    num_verb_classes = 16

    x = jax.random.normal(k_x, (B, C_in, H, W), dtype=jnp.float32)  # NCHW
    params = make_params(
        k_p,
        c_in=C_in,
        hidden_dim=hidden_dim,
        num_queries=num_queries,
        num_obj_classes=num_obj_classes,
        num_verb_classes=num_verb_classes,
        spatial=H * W,
    )

    out = atthoi_forward(params, x, dtype="hoi", dataset="vcoco")

    for k in ("pred_obj_logits", "pred_logits", "pred_obj_boxes", "pred_sub_boxes"):
        jax.block_until_ready(out[k])

    assert out["pred_obj_logits"].shape == (B, num_queries, num_obj_classes + 1)
    assert out["pred_logits"].shape == (B, num_queries, num_verb_classes)
    assert out["pred_obj_boxes"].shape == (B, num_queries, 4)
    assert out["pred_sub_boxes"].shape == (B, num_queries, 4)
    assert bool(jnp.all(jnp.isfinite(out["pred_obj_logits"])))
    assert bool(jnp.all((out["pred_obj_boxes"] >= 0.0) & (out["pred_obj_boxes"] <= 1.0)))
    assert bool(jnp.all((out["pred_sub_boxes"] >= 0.0) & (out["pred_sub_boxes"] <= 1.0)))

    print("KERNEL_OK")
</pallas_src>

<mosaic_0001>
module attributes {stable_mosaic.version = 11 : i64} {
  func.func @_input_proj_kernel(%arg0: i32, %arg1: i32, %arg2: memref<1x4x256xf32, #tpu.memory_space<vmem>>, %arg3: memref<32x4xbf16, #tpu.memory_space<vmem>>, %arg4: memref<32x1xf32, #tpu.memory_space<vmem>>, %arg5: memref<1x32x256xf32, #tpu.memory_space<vmem>>, %arg6: memref<1x32x256xbf16, #tpu.memory_space<vmem>>) attributes {dimension_semantics = [#tpu.dimension_semantics<parallel>, #tpu.dimension_semantics<parallel>], iteration_bounds = array<i64: 2, 1>, scalar_prefetch = 0 : i64, scratch_operands = 0 : i64, tpu.core_type = #tpu.core_type<tc>, window_params = [{transform_indices = @transform_0, window_bounds = array<i64: 1, 4, 256>}, {pipeline_mode = #tpu.pipeline_mode<synchronous>, transform_indices = @transform_1, window_bounds = array<i64: 32, 4>}, {pipeline_mode = #tpu.pipeline_mode<synchronous>, transform_indices = @transform_2, window_bounds = array<i64: 32, 1>}, {transform_indices = @transform_3, window_bounds = array<i64: 1, 32, 256>}, {transform_indices = @transform_4, window_bounds = array<i64: 1, 32, 256>}]} {
    %c0 = arith.constant 0 : index
    %c0_0 = arith.constant 0 : index
    %c0_1 = arith.constant 0 : index
    %0 = vector.load %arg2[%c0, %c0_0, %c0_1] : memref<1x4x256xf32, #tpu.memory_space<vmem>>, vector<1x4x256xf32>
    %1 = vector.shape_cast %0 : vector<1x4x256xf32> to vector<4x256xf32>
    %2 = arith.truncf %1 : vector<4x256xf32> to vector<4x256xbf16>
    %c0_2 = arith.constant 0 : index
    %c0_3 = arith.constant 0 : index
    %3 = vector.load %arg3[%c0_2, %c0_3] : memref<32x4xbf16, #tpu.memory_space<vmem>>, vector<32x4xbf16>
    %cst = arith.constant dense<0.000000e+00> : vector<32x256xf32>
    %4 = tpu.matmul %3, %2, %cst {dimension_numbers = #tpu.dot_dimension_numbers<[1], [0], [0], [1], [0, 0, 1, 1], [], []>} : vector<32x4xbf16>, vector<4x256xbf16>, vector<32x256xf32> -> vector<32x256xf32>
    %c0_4 = arith.constant 0 : index
    %c0_5 = arith.constant 0 : index
    %5 = vector.load %arg4[%c0_4, %c0_5] : memref<32x1xf32, #tpu.memory_space<vmem>>, vector<32x1xf32>
    %6 = vector.broadcast %5 : vector<32x1xf32> to vector<32x256xf32>
    %7 = arith.addf %4, %6 : vector<32x256xf32>
    %c0_6 = arith.constant 0 : index
    %c0_7 = arith.constant 0 : index
    %c0_8 = arith.constant 0 : index
    %8 = vector.load %arg5[%c0_6, %c0_7, %c0_8] : memref<1x32x256xf32, #tpu.memory_space<vmem>>, vector<1x32x256xf32>
    %9 = vector.shape_cast %8 : vector<1x32x256xf32> to vector<32x256xf32>
    %10 = arith.addf %7, %9 : vector<32x256xf32>
    %11 = arith.truncf %10 : vector<32x256xf32> to vector<32x256xbf16>
    %c0_9 = arith.constant 0 : index
    %c0_10 = arith.constant 0 : index
    %c0_11 = arith.constant 0 : index
    %12 = vector.load %arg6[%c0_9, %c0_10, %c0_11] : memref<1x32x256xbf16, #tpu.memory_space<vmem>>, vector<1x32x256xbf16>
    %13 = vector.shape_cast %12 : vector<1x32x256xbf16> to vector<32x256xbf16>
    %14 = vector.shape_cast %11 : vector<32x256xbf16> to vector<1x32x256xbf16>
    tpu.vector_store %arg6[%c0_9, %c0_10, %c0_11], %14 {strides = array<i32>} : memref<1x32x256xbf16, #tpu.memory_space<vmem>>, vector<1x32x256xbf16>,
    return
  }
  func.func @transform_0(%arg0: i32, %arg1: i32) -> (i32, i32, i32) {
    %c0_i32 = arith.constant 0 : i32
    %c0_i32_0 = arith.constant 0 : i32
    return %arg0, %c0_i32, %arg1 : i32, i32, i32
  }
  func.func @transform_1(%arg0: i32, %arg1: i32) -> (i32, i32) {
    %c0_i32 = arith.constant 0 : i32
    %c0_i32_0 = arith.constant 0 : i32
    %c0_i32_1 = arith.constant 0 : i32
    return %c0_i32, %c0_i32_0 : i32, i32
  }
  func.func @transform_2(%arg0: i32, %arg1: i32) -> (i32, i32) {
    %c0_i32 = arith.constant 0 : i32
    %c0_i32_0 = arith.constant 0 : i32
    %c0_i32_1 = arith.constant 0 : i32
    return %c0_i32, %c0_i32_0 : i32, i32
  }
  func.func @transform_3(%arg0: i32, %arg1: i32) -> (i32, i32, i32) {
    %c0_i32 = arith.constant 0 : i32
    %c0_i32_0 = arith.constant 0 : i32
    %c0_i32_1 = arith.constant 0 : i32
    return %c0_i32, %c0_i32_0, %arg1 : i32, i32, i32
  }
  func.func @transform_4(%arg0: i32, %arg1: i32) -> (i32, i32, i32) {
    %c0_i32 = arith.constant 0 : i32
    %c0_i32_0 = arith.constant 0 : i32
    return %arg0, %c0_i32, %arg1 : i32, i32, i32
  }
}

module attributes {stable_mosaic.version = 11 : i64} {
  func.func @_attn_heads_kernel(%arg0: i32, %arg1: memref<8x32xbf16, #tpu.memory_space<vmem>>, %arg2: memref<1x32x256xbf16, #tpu.memory_space<vmem>>, %arg3: memref<32x128xbf16, #tpu.memory_space<vmem>>, %arg4: memref<32x128xbf16, #tpu.memory_space<vmem>>, %arg5: memref<32x128xbf16, #tpu.memory_space<vmem>>, %arg6: memref<1x128xf32, #tpu.memory_space<vmem>>, %arg7: memref<32x32xbf16, #tpu.memory_space<vmem>>, %arg8: memref<1x32xf32, #tpu.memory_space<vmem>>, %arg9: memref<32x32xbf16, #tpu.memory_space<vmem>>, %arg10: memref<1x32xf32, #tpu.memory_space<vmem>>, %arg11: memref<32x32xbf16, #tpu.memory_space<vmem>>, %arg12: memref<1x32xf32, #tpu.memory_space<vmem>>, %arg13: memref<32x32xbf16, #tpu.memory_space<vmem>>, %arg14: memref<1x32xf32, #tpu.memory_space<vmem>>, %arg15: memref<1x8x128xf32, #tpu.memory_space<vmem>>) attributes {dimension_semantics = [#tpu.dimension_semantics<parallel>], iteration_bounds = array<i64: 2>, scalar_prefetch = 0 : i64, scratch_operands = 0 : i64, tpu.core_type = #tpu.core_type<tc>, window_params = [{pipeline_mode = #tpu.pipeline_mode<synchronous>, transform_indices = @transform_0, window_bounds = array<i64: 8, 32>}, {transform_indices = @transform_1, window_bounds = array<i64: 1, 32, 256>}, {pipeline_mode = #tpu.pipeline_mode<synchronous>, transform_indices = @transform_2, window_bounds = array<i64: 32, 128>}, {pipeline_mode = #tpu.pipeline_mode<synchronous>, transform_indices = @transform_3, window_bounds = array<i64: 32, 128>}, {pipeline_mode = #tpu.pipeline_mode<synchronous>, transform_indices = @transform_4, window_bounds = array<i64: 32, 128>}, {pipeline_mode = #tpu.pipeline_mode<synchronous>, transform_indices = @transform_5, window_bounds = array<i64: 1, 128>}, {pipeline_mode = #tpu.pipeline_mode<synchronous>, transform_indices = @transform_6, window_bounds = array<i64: 32, 32>}, {pipeline_mode = #tpu.pipeline_mode<synchronous>, transform_indices = @transform_7, window_bounds = array<i64: 1, 32>}, {pipeline_mode = #tpu.pipeline_mode<synchronous>, transform_indices = @transform_8, window_bounds = array<i64: 32, 32>}, {pipeline_mode = #tpu.pipeline_mode<synchronous>, transform_indices = @transform_9, window_bounds = array<i64: 1, 32>}, {pipeline_mode = #tpu.pipeline_mode<synchronous>, transform_indices = @transform_10, window_bounds = array<i64: 32, 32>}, {pipeline_mode = #tpu.pipeline_mode<synchronous>, transform_indices = @transform_11, window_bounds = array<i64: 1, 32>}, {pipeline_mode = #tpu.pipeline_mode<synchronous>, transform_indices = @transform_12, window_bounds = array<i64: 32, 32>}, {pipeline_mode = #tpu.pipeline_mode<synchronous>, transform_indices = @transform_13, window_bounds = array<i64: 1, 32>}, {transform_indices = @transform_14, window_bounds = array<i64: 1, 8, 128>}]} {
    %c0 = arith.constant 0 : index
    %c0_0 = arith.constant 0 : index
    %0 = vector.load %arg1[%c0, %c0_0] : memref<8x32xbf16, #tpu.memory_space<vmem>>, vector<8x32xbf16>
    %c0_1 = arith.constant 0 : index
    %c0_2 = arith.constant 0 : index
    %c0_3 = arith.constant 0 : index
    %1 = vector.load %arg2[%c0_1, %c0_2, %c0_3] : memref<1x32x256xbf16, #tpu.memory_space<vmem>>, vector<1x32x256xbf16>
    %2 = vector.shape_cast %1 : vector<1x32x256xbf16> to vector<32x256xbf16>
    %cst = arith.constant dense<0.000000e+00> : vector<8x256xf32>
    %3 = tpu.matmul %0, %2, %cst {dimension_numbers = #tpu.dot_dimension_numbers<[1], [0], [0], [1], [0, 0, 1, 1], [], []>} : vector<8x32xbf16>, vector<32x256xbf16>, vector<8x256xf32> -> vector<8x256xf32>
    %cst_4 = arith.constant 0.176776692 : f32
    %4 = vector.broadcast %cst_4 : f32 to vector<8x256xf32>
    %5 = arith.mulf %3, %4 : vector<8x256xf32>
    %cst_5 = arith.constant dense<0xFF800000> : vector<8xf32>
    %6 = vector.multi_reduction <maximumf>, %5, %cst_5 [1] : vector<8x256xf32> to vector<8xf32>
    %7 = vector.shape_cast %6 : vector<8xf32> to vector<8x1xf32>
    %8 = vector.broadcast %7 : vector<8x1xf32> to vector<8x256xf32>
    %9 = arith.subf %5, %8 : vector<8x256xf32>
    %10 = math.exp %9 : vector<8x256xf32>
    %cst_6 = arith.constant dense<0.000000e+00> : vector<8xf32>
    %11 = vector.multi_reduction <add>, %10, %cst_6 [1] : vector<8x256xf32> to vector<8xf32>
    %12 = vector.shape_cast %11 : vector<8xf32> to vector<8x1xf32>
    %13 = tpu.reciprocal %12 {approx = true} : vector<8x1xf32> -> vector<8x1xf32>
    %14 = vector.broadcast %13 : vector<8x1xf32> to vector<8x256xf32>
    %15 = arith.mulf %10, %14 : vector<8x256xf32>
    %16 = arith.truncf %15 : vector<8x256xf32> to vector<8x256xbf16>
    %cst_7 = arith.constant dense<0.000000e+00> : vector<8x32xf32>
    %17 = tpu.matmul %16, %2, %cst_7 {dimension_numbers = #tpu.dot_dimension_numbers<[1], [1], [0], [0], [0, 0, 1, 0], [], []>} : vector<8x256xbf16>, vector<32x256xbf16>, vector<8x32xf32> -> vector<8x32xf32>
    %18 = arith.truncf %17 : vector<8x32xf32> to vector<8x32xbf16>
    %c0_8 = arith.constant 0 : index
    %c0_9 = arith.constant 0 : index
    %19 = vector.load %arg7[%c0_8, %c0_9] : memref<32x32xbf16, #tpu.memory_space<vmem>>, vector<32x32xbf16>
    %cst_10 = arith.constant dense<0.000000e+00> : vector<8x32xf32>
    %20 = tpu.matmul %18, %19, %cst_10 {dimension_numbers = #tpu.dot_dimension_numbers<[1], [0], [0], [1], [0, 0, 1, 1], [], []>} : vector<8x32xbf16>, vector<32x32xbf16>, vector<8x32xf32> -> vector<8x32xf32>
    %c0_11 = arith.constant 0 : index
    %c0_12 = arith.constant 0 : index
    %21 = vector.load %arg8[%c0_11, %c0_12] : memref<1x32xf32, #tpu.memory_space<vmem>>, vector<1x32xf32>
    %22 = vector.broadcast %21 : vector<1x32xf32> to vector<8x32xf32>
    %23 = arith.addf %20, %22 : vector<8x32xf32>
    %cst_13 = arith.constant 0.000000e+00 : f32
    %24 = vector.broadcast %cst_13 : f32 to vector<8x32xf32>
    %25 = arith.maximumf %23, %24 : vector<8x32xf32>
    %26 = arith.truncf %25 : vector<8x32xf32> to vector<8x32xbf16>
    %c0_14 = arith.constant 0 : index
    %c0_15 = arith.constant 0 : index
    %27 = vector.load %arg9[%c0_14, %c0_15] : memref<32x32xbf16, #tpu.memory_space<vmem>>, vector<32x32xbf16>
    %cst_16 = arith.constant dense<0.000000e+00> : vector<8x32xf32>
    %28 = tpu.matmul %26, %27, %cst_16 {dimension_numbers = #tpu.dot_dimension_numbers<[1], [0], [0], [1], [0, 0, 1, 1], [], []>} : vector<8x32xbf16>, vector<32x32xbf16>, vector<8x32xf32> -> vector<8x32xf32>
    %c0_17 = arith.constant 0 : index
    %c0_18 = arith.constant 0 : index
    %29 = vector.load %arg10[%c0_17, %c0_18] : memref<1x32xf32, #tpu.memory_space<vmem>>, vector<1x32xf32>
    %30 = vector.broadcast %29 : vector<1x32xf32> to vector<8x32xf32>
    %31 = arith.addf %28, %30 : vector<8x32xf32>
    %cst_19 = arith.constant 0.000000e+00 : f32
    %32 = vector.broadcast %cst_19 : f32 to vector<8x32xf32>
    %33 = arith.maximumf %31, %32 : vector<8x32xf32>
    %34 = arith.truncf %33 : vector<8x32xf32> to vector<8x32xbf16>
    %c0_20 = arith.constant 0 : index
    %c0_21 = arith.constant 0 : index
    %35 = vector.load %arg11[%c0_20, %c0_21] : memref<32x32xbf16, #tpu.memory_space<vmem>>, vector<32x32xbf16>
    %cst_22 = arith.constant dense<0.000000e+00> : vector<8x32xf32>
    %36 = tpu.matmul %18, %35, %cst_22 {dimension_numbers = #tpu.dot_dimension_numbers<[1], [0], [0], [1], [0, 0, 1, 1], [], []>} : vector<8x32xbf16>, vector<32x32xbf16>, vector<8x32xf32> -> vector<8x32xf32>
    %c0_23 = arith.constant 0 : index
    %c0_24 = arith.constant 0 : index
    %37 = vector.load %arg12[%c0_23, %c0_24] : memref<1x32xf32, #tpu.memory_space<vmem>>, vector<1x32xf32>
    %38 = vector.broadcast %37 : vector<1x32xf32> to vector<8x32xf32>
    %39 = arith.addf %36, %38 : vector<8x32xf32>
    %cst_25 = arith.constant 0.000000e+00 : f32
    %40 = vector.broadcast %cst_25 : f32 to vector<8x32xf32>
    %41 = arith.maximumf %39, %40 : vector<8x32xf32>
    %42 = arith.truncf %41 : vector<8x32xf32> to vector<8x32xbf16>
    %c0_26 = arith.constant 0 : index
    %c0_27 = arith.constant 0 : index
    %43 = vector.load %arg13[%c0_26, %c0_27] : memref<32x32xbf16, #tpu.memory_space<vmem>>, vector<32x32xbf16>
    %cst_28 = arith.constant dense<0.000000e+00> : vector<8x32xf32>
    %44 = tpu.matmul %42, %43, %cst_28 {dimension_numbers = #tpu.dot_dimension_numbers<[1], [0], [0], [1], [0, 0, 1, 1], [], []>} : vector<8x32xbf16>, vector<32x32xbf16>, vector<8x32xf32> -> vector<8x32xf32>
    %c0_29 = arith.constant 0 : index
    %c0_30 = arith.constant 0 : index
    %45 = vector.load %arg14[%c0_29, %c0_30] : memref<1x32xf32, #tpu.memory_space<vmem>>, vector<1x32xf32>
    %46 = vector.broadcast %45 : vector<1x32xf32> to vector<8x32xf32>
    %47 = arith.addf %44, %46 : vector<8x32xf32>
    %cst_31 = arith.constant 0.000000e+00 : f32
    %48 = vector.broadcast %cst_31 : f32 to vector<8x32xf32>
    %49 = arith.maximumf %47, %48 : vector<8x32xf32>
    %50 = arith.truncf %49 : vector<8x32xf32> to vector<8x32xbf16>
    %c0_32 = arith.constant 0 : index
    %c0_33 = arith.constant 0 : index
    %51 = vector.load %arg3[%c0_32, %c0_33] : memref<32x128xbf16, #tpu.memory_space<vmem>>, vector<32x128xbf16>
    %cst_34 = arith.constant dense<0.000000e+00> : vector<8x128xf32>
    %52 = tpu.matmul %18, %51, %cst_34 {dimension_numbers = #tpu.dot_dimension_numbers<[1], [0], [0], [1], [0, 0, 1, 1], [], []>} : vector<8x32xbf16>, vector<32x128xbf16>, vector<8x128xf32> -> vector<8x128xf32>
    %c0_35 = arith.constant 0 : index
    %c0_36 = arith.constant 0 : index
    %53 = vector.load %arg4[%c0_35, %c0_36] : memref<32x128xbf16, #tpu.memory_space<vmem>>, vector<32x128xbf16>
    %cst_37 = arith.constant dense<0.000000e+00> : vector<8x128xf32>
    %54 = tpu.matmul %34, %53, %cst_37 {dimension_numbers = #tpu.dot_dimension_numbers<[1], [0], [0], [1], [0, 0, 1, 1], [], []>} : vector<8x32xbf16>, vector<32x128xbf16>, vector<8x128xf32> -> vector<8x128xf32>
    %55 = arith.addf %52, %54 : vector<8x128xf32>
    %c0_38 = arith.constant 0 : index
    %c0_39 = arith.constant 0 : index
    %56 = vector.load %arg5[%c0_38, %c0_39] : memref<32x128xbf16, #tpu.memory_space<vmem>>, vector<32x128xbf16>
    %cst_40 = arith.constant dense<0.000000e+00> : vector<8x128xf32>
    %57 = tpu.matmul %50, %56, %cst_40 {dimension_numbers = #tpu.dot_dimension_numbers<[1], [0], [0], [1], [0, 0, 1, 1], [], []>} : vector<8x32xbf16>, vector<32x128xbf16>, vector<8x128xf32> -> vector<8x128xf32>
    %58 = arith.addf %55, %57 : vector<8x128xf32>
    %c0_41 = arith.constant 0 : index
    %c0_42 = arith.constant 0 : index
    %59 = vector.load %arg6[%c0_41, %c0_42] : memref<1x128xf32, #tpu.memory_space<vmem>>, vector<1x128xf32>
    %60 = vector.broadcast %59 : vector<1x128xf32> to vector<8x128xf32>
    %61 = arith.addf %58, %60 : vector<8x128xf32>
    %62 = tpu.iota {dimensions = array<i32: 1>} : vector<8x128xi32>
    %c24_i32 = arith.constant 24 : i32
    %63 = vector.broadcast %c24_i32 : i32 to vector<8x128xi32>
    %64 = arith.cmpi sge, %62, %63 : vector<8x128xi32>
    %c32_i32 = arith.constant 32 : i32
    %65 = vector.broadcast %c32_i32 : i32 to vector<8x128xi32>
    %66 = arith.cmpi slt, %62, %65 : vector<8x128xi32>
    %67 = arith.andi %64, %66 : vector<8x128xi1>
    %68 = arith.negf %61 : vector<8x128xf32>
    %69 = math.exp %68 : vector<8x128xf32>
    %cst_43 = arith.constant 1.000000e+00 : f32
    %70 = vector.broadcast %cst_43 : f32 to vector<8x128xf32>
    %71 = arith.addf %70, %69 : vector<8x128xf32>
    %72 = arith.divf %70, %71 : vector<8x128xf32>
    %73 = arith.select %67, %72, %61 : vector<8x128xi1>, vector<8x128xf32>
    %c0_44 = arith.constant 0 : index
    %c0_45 = arith.constant 0 : index
    %c0_46 = arith.constant 0 : index
    %74 = vector.load %arg15[%c0_44, %c0_45, %c0_46] : memref<1x8x128xf32, #tpu.memory_space<vmem>>, vector<1x8x128xf32>
    %75 = vector.shape_cast %74 : vector<1x8x128xf32> to vector<8x128xf32>
    %76 = vector.shape_cast %73 : vector<8x128xf32> to vector<1x8x128xf32>
    tpu.vector_store %arg15[%c0_44, %c0_45, %c0_46], %76 {strides = array<i32>} : memref<1x8x128xf32, #tpu.memory_space<vmem>>, vector<1x8x128xf32>,
    return
  }
  func.func @transform_0(%arg0: i32) -> (i32, i32) {
    %c0_i32 = arith.constant 0 : i32
    %c0_i32_0 = arith.constant 0 : i32
    %c0_i32_1 = arith.constant 0 : i32
    return %c0_i32, %c0_i32_0 : i32, i32
  }
  func.func @transform_1(%arg0: i32) -> (i32, i32, i32) {
    %c0_i32 = arith.constant 0 : i32
    %c0_i32_0 = arith.constant 0 : i32
    %c0_i32_1 = arith.constant 0 : i32
    return %arg0, %c0_i32, %c0_i32_0 : i32, i32, i32
  }
  func.func @transform_2(%arg0: i32) -> (i32, i32) {
    %c0_i32 = arith.constant 0 : i32
    %c0_i32_0 = arith.constant 0 : i32
    %c0_i32_1 = arith.constant 0 : i32
    return %c0_i32, %c0_i32_0 : i32, i32
  }
  func.func @transform_3(%arg0: i32) -> (i32, i32) {
    %c0_i32 = arith.constant 0 : i32
    %c0_i32_0 = arith.constant 0 : i32
    %c0_i32_1 = arith.constant 0 : i32
    return %c0_i32, %c0_i32_0 : i32, i32
  }
  func.func @transform_4(%arg0: i32) -> (i32, i32) {
    %c0_i32 = arith.constant 0 : i32
    %c0_i32_0 = arith.constant 0 : i32
    %c0_i32_1 = arith.constant 0 : i32
    return %c0_i32, %c0_i32_0 : i32, i32
  }
  func.func @transform_5(%arg0: i32) -> (i32, i32) {
    %c0_i32 = arith.constant 0 : i32
    %c0_i32_0 = arith.constant 0 : i32
    %c0_i32_1 = arith.constant 0 : i32
    return %c0_i32, %c0_i32_0 : i32, i32
  }
  func.func @transform_6(%arg0: i32) -> (i32, i32) {
    %c0_i32 = arith.constant 0 : i32
    %c0_i32_0 = arith.constant 0 : i32
    %c0_i32_1 = arith.constant 0 : i32
    return %c0_i32, %c0_i32_0 : i32, i32
  }
  func.func @transform_7(%arg0: i32) -> (i32, i32) {
    %c0_i32 = arith.constant 0 : i32
    %c0_i32_0 = arith.constant 0 : i32
    %c0_i32_1 = arith.constant 0 : i32
    return %c0_i32, %c0_i32_0 : i32, i32
  }
  func.func @transform_8(%arg0: i32) -> (i32, i32) {
    %c0_i32 = arith.constant 0 : i32
    %c0_i32_0 = arith.constant 0 : i32
    %c0_i32_1 = arith.constant 0 : i32
    return %c0_i32, %c0_i32_0 : i32, i32
  }
  func.func @transform_9(%arg0: i32) -> (i32, i32) {
    %c0_i32 = arith.constant 0 : i32
    %c0_i32_0 = arith.constant 0 : i32
    %c0_i32_1 = arith.constant 0 : i32
    return %c0_i32, %c0_i32_0 : i32, i32
  }
  func.func @transform_10(%arg0: i32) -> (i32, i32) {
    %c0_i32 = arith.constant 0 : i32
    %c0_i32_0 = arith.constant 0 : i32
    %c0_i32_1 = arith.constant 0 : i32
    return %c0_i32, %c0_i32_0 : i32, i32
  }
  func.func @transform_11(%arg0: i32) -> (i32, i32) {
    %c0_i32 = arith.constant 0 : i32
    %c0_i32_0 = arith.constant 0 : i32
    %c0_i32_1 = arith.constant 0 : i32
    return %c0_i32, %c0_i32_0 : i32, i32
  }
  func.func @transform_12(%arg0: i32) -> (i32, i32) {
    %c0_i32 = arith.constant 0 : i32
    %c0_i32_0 = arith.constant 0 : i32
    %c0_i32_1 = arith.constant 0 : i32
    return %c0_i32, %c0_i32_0 : i32, i32
  }
  func.func @transform_13(%arg0: i32) -> (i32, i32) {
    %c0_i32 = arith.constant 0 : i32
    %c0_i32_0 = arith.constant 0 : i32
    %c0_i32_1 = arith.constant 0 : i32
    return %c0_i32, %c0_i32_0 : i32, i32
  }
  func.func @transform_14(%arg0: i32) -> (i32, i32, i32) {
    %c0_i32 = arith.constant 0 : i32
    %c0_i32_0 = arith.constant 0 : i32
    %c0_i32_1 = arith.constant 0 : i32
    return %arg0, %c0_i32, %c0_i32_0 : i32, i32, i32
  }
}

</mosaic_0001>

<bundles_post_ra>
// kernel: _atthoi_forward_arrays.2
= control target key start
LH: loop header
LB: loop body
LE: loop exit
PB: predicated region body
PF: predicated region fallthrough
CT: control target
= control target key end

     0   :  { %s592_s15 = smov 0   ;;  %s594_s16 = smov 0   ;;  %s677_s0 = inlined_call_operand.vmem [shape: f32[2,4,256], index: 0, kind: input, shape index: {}]   ;;  %s678_s1 = inlined_call_operand.vmem [shape: bf16[32,4], index: 1, kind: input, shape index: {}]   ;;  %s679_s2 = inlined_call_operand.vmem [shape: f32[32,1], index: 2, kind: input, shape index: {}]   ;;  %s680_s3 = inlined_call_operand.vmem [shape: f32[1,32,256], index: 3, kind: input, shape index: {}]   ;;  %s681_s4 = inlined_call_operand.vmem [shape: bf16[2,32,256], index: 4, kind: output, shape index: {}]  }
   0x1   :  { %s596_s17 = smov 0  }
   0x2 LB: > { %s26_s18 = sadd.s32 1, %s560_s16  ;;  %p490_p0 = scmp.ge.s32.totalorder %s564_s17, 1  ;;  %s564_s17 = sphi %s596_s17, %s14_s17   ;;  %s560_s16 = sphi %s594_s16, %s683_s16   ;;  %s556_s15 = sphi %s592_s15, %s682_s15  }
   0x3   : > { %p28_p1 = scmp.ge.s32.totalorder %s26_s18, 2  ;;  %p194_p2 = scmp.lt.s32.totalorder %s564_s17, 3 }
   0x5   : > { %s685_s18 = smov (%p28_p1, %s26_s18), 0  ;;  %p195_p3 = pnand %p490_p0, %p194_p2 }
   0x6   : > { %p234_p4 = scmp.lt.s32.totalorder (!%p195_p3), %s556_s15, 1 }
   0x7   : > { %198 = sbr.rel (%p195_p3) target bundleno = 178 (0xb2), region = 36 }
   0xc   : > { %v566_v0 = vmov 0   ;;  %v275_v1 = vld [vmem:[%s679_s2 + $0x10] sm:$0xff]  ;;  %v273_v2 = vld [vmem:[%s679_s2] sm:$0xff]  ;;  %s687_s15 = smov (!%p234_p4, %s556_s15), 1  ;;  %v276_v4 = vld [vmem:[%s679_s2 + $0x18] sm:$0xff]  ;;  %vm314_vm0 = vcmask 1041408  }
   0xd   : > { %541 = vset.pattern.permute.xlu1 %v566_v0  ;;  %540 = vset.pattern.permute.xlu0 %v566_v0  ;;  %s509_s23 = sshll.u32 %s687_s15, 3  ;;  %v274_v5 = vld [vmem:[%s679_s2 + $0x8] sm:$0xff]  ;;  %v511_v12 = vld [vmem:[%s678_s1] sm:$0xff]  ;;  %vm307_vm1 = vcmask 31744   ;;  %s510_s13 = sshll.u32 %s687_s15, 5  ;;  %v361_v33 = vld [vmem:[%s680_s3 + $0x10] sm:$0xff] }
   0xe   : > { %289 = vperm.xlu1 %541, %v275_v1   ;;  %279 = vperm.xlu0 %540, %v273_v2   ;;  %s241_s26 = scalar_lea.vmem %s677_s0, %s509_s23  ;;  %v512_v13 = vld [vmem:[%s678_s1 + $0x8] sm:$0xff]  ;;  %v359_v16 = vld [vmem:[%s680_s3] sm:$0xff]  ;;  %s644_s20 = scalar_lea.vmem %s681_s4, %s510_s13  ;;  %v362_v37 = vld [vmem:[%s680_s3 + $0x18] sm:$0xff] }
   0xf   : > { %v260_v3 = vld [vmem:[%s241_s26] sm:$0xff]  ;;  %v360_v19 = vld [vmem:[%s680_s3 + $0x8] sm:$0xff]  ;;  %v365_v46 = vld [vmem:[%s680_s3 + $0x30] sm:$0xff] }
  0x10   : > { %262 = vst [vmem:[#allocation1] ss:$2 sm:$0xff] %v260_v3  ;;  %v363_v26 = vld [vmem:[%s680_s3 + $0x20] sm:$0xff]  ;;  %v364_v29 = vld [vmem:[%s680_s3 + $0x28] sm:$0xff]  ;;  %v366_v49 = vld [vmem:[%s680_s3 + $0x38] sm:$0xff] }
  0x16   : > { %294 = vperm.xlu1 %541, %v276_v4   ;;  %284 = vperm.xlu0 %540, %v274_v5  }
  0x17   : > { %v263_v6 = vld.sshfl [vmem:[#allocation1] sm:$0xff pattern:$0x75316420]  ;;  %v264_v7 = vld.sshfl [vmem:[#allocation1 + $0x8] sm:$0xff pattern:$0x75316420] }
  0x18   : > { %v267_v8 = vpack.c.bf16 %v263_v6, %v263_v6  ;;  %v268_v9 = vpack.c.bf16 %v264_v7, %v264_v7 }
  0x1a   : > { %v316_v10 = vsel %vm314_vm0, %v267_v8, 0  ;;  %v319_v11 = vsel %vm314_vm0, %v268_v9, 0 }
  0x1b   : > { %328 = vmatpush.bf16.msra.mxu0 %v316_v10  ;;  %513 = vmatpush.bf16.msra.mxu2 %v316_v10 }
  0x1c   : > { %347 = vmatpush.bf16.msra.mxu1 %v319_v11  ;;  %514 = vmatpush.bf16.msra.mxu3 %v319_v11 }
  0x1e   : > { %503 = vmatmul.msk.bf16.vlgmr.msra.gmra.mxu0 %vm307_vm1, %v511_v12  ;;  %504 = vmatmul.msk.bf16.vlgmr.msra.gmra.mxu2 %vm307_vm1, %v512_v13 }
  0x1f   : > { %505 = vmatmul.msk.bf16.vlgmr.msra.gmra.mxu1 %vm307_vm1, %v511_v12  ;;  %506 = vmatmul.msk.bf16.vlgmr.msra.gmra.mxu3 %vm307_vm1, %v512_v13 }
  0x80   : > { %v280_v14 = vpop.permute.xlu0 %279  ;;  %v290_v22 = vpop.permute.xlu1 %289 }
  0x88   : > { %v285_v30 = vpop.permute.xlu0 %284  ;;  %v295_v43 = vpop.permute.xlu1 %294 }
  0x9b   : > { %v330_v15 = vpop.f32.mrf.mxu0 }
  0x9c   : > { %v331_v17 = vadd.f32 %v330_v15, %v280_v14  ;;  %v349_v18 = vpop.f32.mrf.mxu1 }
  0x9d   : > { %v350_v20 = vadd.f32 %v349_v18, %v280_v14 }
  0x9e   : > { %v367_v21 = vadd.f32 %v359_v16, %v331_v17 }
  0x9f   : > { %v368_v23 = vadd.f32 %v360_v19, %v350_v20 }
  0xa1   : > { %v375_v24 = vpack.c.bf16 %v368_v23, %v367_v21  ;;  %v335_v25 = vpop.f32.mrf.mxu2 }
  0xa2   : > { %v336_v27 = vadd.f32 %v335_v25, %v290_v22  ;;  %v354_v28 = vpop.f32.mrf.mxu3 }
  0xa3   : > { %379 = vst [vmem:[%s644_s20] sm:$0xff] %v375_v24  ;;  %v355_v31 = vadd.f32 %v354_v28, %v290_v22  ;;  %v332_v32 = vpop.f32.mrf.mxu0 }
  0xa4   : > { %v371_v34 = vadd.f32 %v363_v26, %v336_v27  ;;  %v333_v35 = vadd.f32 %v332_v32, %v285_v30  ;;  %v351_v36 = vpop.f32.mrf.mxu1 }
  0xa5   : > { %v372_v38 = vadd.f32 %v364_v29, %v355_v31  ;;  %v352_v39 = vadd.f32 %v351_v36, %v285_v30 }
  0xa6   : > { %v369_v40 = vadd.f32 %v361_v33, %v333_v35 }
  0xa7   : > { %v377_v41 = vpack.c.bf16 %v372_v38, %v371_v34  ;;  %v370_v42 = vadd.f32 %v362_v37, %v352_v39 }
  0xa9   : > { %381 = vst [vmem:[%s644_s20 + $0x10] sm:$0xff] %v377_v41  ;;  %v376_v44 = vpack.c.bf16 %v370_v42, %v369_v40  ;;  %v337_v45 = vpop.f32.mrf.mxu2 }
  0xaa   : > { %v338_v47 = vadd.f32 %v337_v45, %v295_v43  ;;  %v356_v48 = vpop.f32.mrf.mxu3 }
  0xab   : > { %380 = vst [vmem:[%s644_s20 + $0x8] sm:$0xff] %v376_v44  ;;  %v357_v50 = vadd.f32 %v356_v48, %v295_v43 }
  0xac   : > { %v373_v51 = vadd.f32 %v365_v46, %v338_v47 }
  0xad   : > { %v374_v52 = vadd.f32 %v366_v49, %v357_v50 }
  0xaf   : > { %v378_v53 = vpack.c.bf16 %v374_v52, %v373_v51 }
  0xb1   : > { %382 = vst [vmem:[%s644_s20 + $0x18] sm:$0xff] %v378_v53 }
  0xb2 PF: > { %s14_s17 = sadd.s32 1, %s564_s17   ;;  %s682_s15 = smov %s560_s16 }
  0xb3   : > { %p11_p5 = scmp.ge.s32.totalorder %s14_s17, 4   ;;  %s683_s16 = smov %s685_s18 }
  0xb5   :  { %13 = sbr.rel (!%p11_p5) target bundleno = 2 (0x2), region = 69 }

// kernel: _atthoi_forward_arrays.3
= control target key start
LH: loop header
LB: loop body
LE: loop exit
PB: predicated region body
PF: predicated region fallthrough
CT: control target
= control target key end

     0   :  { %s1112_s29 = smov 0   ;;  %s1202_s0 = inlined_call_operand.vmem [shape: bf16[8,32], index: 0, kind: input, shape index: {}]   ;;  %s1203_s1 = inlined_call_operand.vmem [shape: bf16[2,32,256], index: 1, kind: input, shape index: {}]   ;;  %s1204_s2 = inlined_call_operand.vmem [shape: bf16[32,128], index: 2, kind: input, shape index: {}]   ;;  %s1205_s3 = inlined_call_operand.vmem [shape: bf16[32,128], index: 3, kind: input, shape index: {}]   ;;  %s1206_s4 = inlined_call_operand.vmem [shape: bf16[32,128], index: 4, kind: input, shape index: {}]   ;;  %s1207_s5 = inlined_call_operand.vmem [shape: f32[1,128], index: 5, kind: input, shape index: {}]   ;;  %s1208_s6 = inlined_call_operand.vmem [shape: bf16[32,32], index: 6, kind: input, shape index: {}]   ;;  %s1209_s7 = inlined_call_operand.vmem [shape: f32[1,32], index: 7, kind: input, shape index: {}]   ;;  %s1210_s8 = inlined_call_operand.vmem [shape: bf16[32,32], index: 8, kind: input, shape index: {}]   ;;  %s1211_s9 = inlined_call_operand.vmem [shape: f32[1,32], index: 9, kind: input, shape index: {}]   ;;  %s1212_s10 = inlined_call_operand.vmem [shape: bf16[32,32], index: 10, kind: input, shape index: {}]   ;;  %s1213_s11 = inlined_call_operand.vmem [shape: f32[1,32], index: 11, kind: input, shape index: {}]   ;;  %s1214_s12 = inlined_call_operand.vmem [shape: bf16[32,32], index: 12, kind: input, shape index: {}]   ;;  %s1215_s13 = inlined_call_operand.vmem [shape: f32[1,32], index: 13, kind: input, shape index: {}]   ;;  %s1216_s14 = inlined_call_operand.vmem [shape: f32[2,8,128], index: 14, kind: output, shape index: {}]  }
   0x1 LB: > { %s895_s30 = sadd.s32 4294967295, %s1035_s29   ;;  %p899_p0 = scmp.ge.s32.totalorder %s1035_s29, 1  ;;  %s1035_s29 = sphi %s1112_s29, %s24_s29  }
   0x2   : > { %p412_p1 = scmp.lt.s32.totalorder %s1035_s29, 3 }
   0x4   : > { %p413_p2 = pnand %p899_p0, %p412_p1 }
   0x5   : > { %p457_p3 = scmp.lt.s32.totalorder (!%p413_p2), %s895_s30, 1 }
   0x6   : > { %416 = sbr.rel (%p413_p2) target bundleno = 990 (0x3de), region = 76 }
   0xb   : > { %s1218_s30 = smov (!%p457_p3, %s895_s30), 1  ;;  %v467_v12 = vld [vmem:[%s1202_s0] sm:$0xf]  ;;  %vm492_vm0 = vcmask 261120   ;;  %v997_v28 = vld [vmem:[%s1212_s10 + $0x8] sm:$0xff] }
   0xc   : > { %s987_s15 = sshll.u32 %s1218_s30, 5  ;;  %v993_v29 = vld [vmem:[%s1208_s6 + $0x8] sm:$0xff]  ;;  %v996_v30 = vld [vmem:[%s1212_s10] sm:$0xff]  ;;  %s902_s17 = sshll.u32 %s1218_s30, 3 }
   0xd   : > { %s461_s18 = scalar_lea.vmem %s1203_s1, %s987_s15  ;;  %v992_v37 = vld [vmem:[%s1208_s6] sm:$0xff]  ;;  %v999_v38 = vld [vmem:[%s1214_s12 + $0x8] sm:$0xff]  ;;  %s465_s20 = scalar_lea.vmem %s1216_s14, %s902_s17 }
   0xe   : > { %v913_v0 = vld [vmem:[%s461_s18 + $0x10] sm:$0xf]  ;;  %v991_v1 = vld [vmem:[%s461_s18 + $0x14] sm:$0xf0]  ;;  %v990_v2 = vld [vmem:[%s461_s18 + $0x14] sm:$0xf] }
   0xf   : > { %v914_v3 = vor.u32 %v991_v1, %v913_v0  ;;  %v915_v4 = vld [vmem:[%s461_s18 + $0x18] sm:$0xf0]  ;;  %v905_v5 = vld [vmem:[%s461_s18] sm:$0xf]  ;;  %v989_v6 = vld [vmem:[%s461_s18 + $0x4] sm:$0xf0] }
  0x10   : > { %v918_v7 = vor.u32 %v990_v2, %v915_v4  ;;  %v988_v8 = vld [vmem:[%s461_s18 + $0x4] sm:$0xf]  ;;  %v907_v9 = vld [vmem:[%s461_s18 + $0x8] sm:$0xf0]  ;;  %v906_v10 = vor.u32 %v989_v6, %v905_v5  ;;  %v1014_v50 = vld [vmem:[%s1209_s7] ss:$0 sm:$0xff] }
  0x11   : > { %502 = vmatpush.bf16.msra.mxu0 %v914_v3  ;;  %547 = vmatpush.bf16.xpose.msra.mxu2 %v914_v3  ;;  %v910_v11 = vor.u32 %v988_v8, %v907_v9  ;;  %v995_v45 = vld [vmem:[%s1210_s8 + $0x8] sm:$0xff]  ;;  %v994_v46 = vld [vmem:[%s1210_s8] sm:$0xff] }
  0x12   : > { %515 = vmatpush.bf16.msra.mxu1 %v918_v7  ;;  %560 = vmatpush.bf16.xpose.msra.mxu3 %v918_v7  ;;  %v998_v47 = vld [vmem:[%s1214_s12] sm:$0xff]  ;;  %v1001_v48 = vld [vmem:[%s1204_s2 + $0x8] sm:$0xff] }
  0x13   : > { %v1000_v49 = vld [vmem:[%s1204_s2] sm:$0xff]  ;;  %v1003_v62 = vld [vmem:[%s1205_s3 + $0x8] sm:$0xff] }
  0x14   : > { %v1015_v54 = vld [vmem:[%s1213_s11] ss:$0 sm:$0xff]  ;;  %v1005_v0 = vld [vmem:[%s1206_s4 + $0x8] sm:$0xff] }
  0x15   : > { %503 = vmatpush.bf16.msra.mxu0 %v906_v10  ;;  %v1002_v63 = vld [vmem:[%s1205_s3] sm:$0xff] }
  0x16   : > { %516 = vmatpush.bf16.msra.mxu1 %v910_v11  ;;  %v1004_v1 = vld [vmem:[%s1206_s4] sm:$0xff] }
  0x17   : > { %v1016_v2 = vld [vmem:[%s1211_s9] ss:$0 sm:$0xff] }
  0x18   : > { %919 = vmatmul.msk.bf16.vlgmr.msra.gmra.mxu0 %vm492_vm0, %v467_v12  ;;  %v1017_v8 = vld [vmem:[%s1215_s13] ss:$0 sm:$0xff] }
  0x19   : > { %920 = vmatmul.msk.bf16.vlgmr.msra.gmra.mxu1 %vm492_vm0, %v467_v12  ;;  %548 = vmatpush.bf16.xpose.msra.mxu2 %v906_v10 }
  0x1a   : > { %561 = vmatpush.bf16.xpose.msra.mxu3 %v910_v11  ;;  %597 = vmatpush.bf16.msrb.mxu0 %v993_v29 }
  0x1b   : > { %635 = vmatpush.bf16.msrb.mxu1 %v995_v45 }
  0x1e   : > { %598 = vmatpush.bf16.msrb.mxu0 %v992_v37 }
  0x1f   : > { %636 = vmatpush.bf16.msrb.mxu1 %v994_v46 }
  0x21   : > { %670 = vmatpush.bf16.msrb.mxu2 %v997_v28 }
  0x22   : > { %708 = vmatpush.bf16.msrb.mxu3 %v999_v38  ;;  %746 = vmatpush.bf16.msra.mxu0 %v1003_v62 }
  0x23   : > { %771 = vmatpush.bf16.msra.mxu1 %v1001_v48 }
  0x25   : > { %671 = vmatpush.bf16.msrb.mxu2 %v996_v30 }
  0x26   : > { %709 = vmatpush.bf16.msrb.mxu3 %v998_v47  ;;  %747 = vmatpush.bf16.msra.mxu0 %v1002_v63 }
  0x27   : > { %772 = vmatpush.bf16.msra.mxu1 %v1000_v49 }
  0x95   : > { %v505_v13 = vpop.f32.mrf.mxu0 }
  0x96   : > { %v522_v14 = vmul.f32 0.17677669, %v505_v13  ;;  %v518_v15 = vpop.f32.mrf.mxu1 }
  0x97   : > { %v523_v16 = vmul.f32 0.17677669, %v518_v15 }
  0x99   : > { %v524_v17 = vmax.f32 %v522_v14, %v523_v16 }
  0x9b   : > { %525 = vmax.xlane.f32.xlu0 %v524_v17 }
  0x9d   : > { %v507_v18 = vpop.f32.mrf.mxu0 }
  0x9e   : > { %v520_v19 = vpop.f32.mrf.mxu1 }
  0x9f   : > { %v1018_v19 = vld [vmem:[%s1207_s5] ss:$0 sm:$0xff] }
 0x10e   : > { %v526_v20 = vpop.xlane.xlu0 %525 }
 0x10f   : > { %v527_v21 = vsub.f32 %v522_v14, %v526_v20  ;;  %v528_v22 = vsub.f32 %v523_v16, %v526_v20 }
 0x111   : > { %v529_v23 = vmul.f32 1.442695, %v527_v21  ;;  %v531_v24 = vmul.f32 1.442695, %v528_v22 }
 0x113   : > { %1019 = vpow2.f32 %v529_v23 }
 0x114   : > { %1021 = vpow2.f32 %v531_v24 }
 0x119   : > { %v1020_v25 = vpop.eup %1019 }
 0x11a   : > { %v1022_v26 = vpop.eup %1021 }
 0x11b   : > { %v533_v27 = vadd.f32 %v1022_v26, %v1020_v25 }
 0x11d   : > { %534 = vadd.xlane.f32.xlu0 %v533_v27  ;;  %v816_v27 = vlaneseq }
 0x11f   : > { %v817_v29 = vand.u32 127, %v816_v27 }
 0x121   : > { %vm818_vm1 = vcmp.ge.s32.totalorder %v817_v29, 24  ;;  %vm819_vm2 = vcmp.lt.s32.totalorder %v817_v29, 32 }
 0x122   : > { %vm820_vm4 = vmand %vm818_vm1, %vm819_vm2 }
 0x190   : > { %v535_v31 = vpop.xlane.xlu0 %534 }
 0x191   : > { %1023 = vrcp.f32 %v535_v31 }
 0x197   : > { %v1024_v32 = vpop.eup %1023 }
 0x198   : > { %v537_v33 = vmul.f32 %v1024_v32, %v1020_v25  ;;  %v538_v34 = vmul.f32 %v1024_v32, %v1022_v26 }
 0x19a   : > { %v539_v35 = vpack.c.bf16 %v537_v33, %v537_v33  ;;  %v540_v36 = vpack.c.bf16 %v538_v34, %v538_v34 }
 0x19c   : > { %549 = vmatmul.bf16.vlgmr.msra.gmra.mxu2 %v539_v35  ;;  %562 = vmatmul.bf16.vlgmr.msra.gmra.mxu3 %v540_v36 }
 0x19d   : > { %803 = vmatpush.bf16.msra.mxu2 %v1005_v0 }
 0x1a1   : > { %804 = vmatpush.bf16.msra.mxu2 %v1004_v1 }
 0x21f   : > { %v550_v39 = vpop.f32.mrf.mxu2  ;;  %v563_v40 = vpop.f32.mrf.mxu3 }
 0x220   : > { %v564_v41 = vadd.f32 %v563_v40, %v550_v39 }
 0x222   : > { %v567_v42 = vpack.c.bf16 %v564_v41, %v564_v41 }
 0x224   : > { %929 = vmatmul.msk.bf16.vlgmr.msrb.gmra.mxu0 %vm492_vm0, %v567_v42  ;;  %947 = vmatmul.msk.bf16.vlgmr.msrb.gmra.mxu2 %vm492_vm0, %v567_v42 }
 0x227   : > { %v552_v43 = vpop.f32.mrf.mxu2  ;;  %v565_v44 = vpop.f32.mrf.mxu3 }
 0x2a1   : > { %v600_v51 = vpop.f32.mrf.mxu0 }
 0x2a2   : > { %v601_v52 = vadd.f32 %v1014_v50, %v600_v51 }
 0x2a4   : > { %v604_v53 = vmax.f32 %v601_v52, 0.0 }
 0x2a6   : > { %v605_v55 = vpack.c.bf16 %v604_v53, %v604_v53 }
 0x2a7   : > { %v673_v56 = vpop.f32.mrf.mxu2 }
 0x2a8   : > { %v674_v57 = vadd.f32 %v1015_v54, %v673_v56  ;;  %938 = vmatmul.msk.bf16.vlgmr.msrb.gmra.mxu1 %vm492_vm0, %v605_v55 }
 0x2a9   : > { %v602_v58 = vpop.f32.mrf.mxu0 }
 0x2aa   : > { %v677_v59 = vmax.f32 %v674_v57, 0.0 }
 0x2ac   : > { %v678_v60 = vpack.c.bf16 %v677_v59, %v677_v59 }
 0x2ae   : > { %956 = vmatmul.msk.bf16.vlgmr.msrb.gmra.mxu3 %vm492_vm0, %v678_v60 }
 0x2af   : > { %v675_v61 = vpop.f32.mrf.mxu2 }
 0x2b8   : > { %974 = vmatmul.msk.bf16.vlgmr.msra.gmra.mxu1 %vm492_vm0, %v567_v42 }
 0x325   : > { %v638_v3 = vpop.f32.mrf.mxu1 }
 0x326   : > { %v639_v4 = vadd.f32 %v1016_v2, %v638_v3 }
 0x328   : > { %v642_v5 = vmax.f32 %v639_v4, 0.0 }
 0x32a   : > { %v643_v6 = vpack.c.bf16 %v642_v5, %v642_v5 }
 0x32c   : > { %965 = vmatmul.msk.bf16.vlgmr.msra.gmra.mxu0 %vm492_vm0, %v643_v6 }
 0x32d   : > { %v640_v7 = vpop.f32.mrf.mxu1 }
 0x331   : > { %v711_v9 = vpop.f32.mrf.mxu3 }
 0x332   : > { %v712_v10 = vadd.f32 %v1017_v8, %v711_v9 }
 0x334   : > { %v715_v11 = vmax.f32 %v712_v10, 0.0 }
 0x335   : > { %v774_v12 = vpop.f32.mrf.mxu1 }
 0x336   : > { %v716_v13 = vpack.c.bf16 %v715_v11, %v715_v11 }
 0x338   : > { %983 = vmatmul.msk.bf16.vlgmr.msra.gmra.mxu2 %vm492_vm0, %v716_v13 }
 0x339   : > { %v713_v14 = vpop.f32.mrf.mxu3 }
 0x33d   : > { %v776_v15 = vpop.f32.mrf.mxu1 }
 0x3a9   : > { %v749_v16 = vpop.f32.mrf.mxu0 }
 0x3aa   : > { %v775_v18 = vadd.f32 %v774_v12, %v749_v16 }
 0x3b1   : > { %v751_v17 = vpop.f32.mrf.mxu0 }
 0x3bb   : > { %v806_v20 = vpop.f32.mrf.mxu2 }
 0x3bc   : > { %v810_v21 = vadd.f32 %v806_v20, %v775_v18 }
 0x3be   : > { %v815_v22 = vadd.f32 %v1018_v19, %v810_v21 }
 0x3c0   : > { %v984_v23 = vmul.f32 -1.442695, %v815_v22 }
 0x3c2   : > { %1025 = vpow2.f32 %v984_v23 }
 0x3c3   : > { %v808_v24 = vpop.f32.mrf.mxu2 }
 0x3c8   : > { %v1026_v25 = vpop.eup %1025 }
 0x3c9   : > { %v824_v26 = vadd.f32 1.0, %v1026_v25 }
 0x3cb   : > { %1027 = vrcp.f32 %v824_v26  ;;  %v836_v32 = vand.u32 2147483648, %v824_v26  ;;  %v834_v34 = vand.u32 2147483647, %v824_v26  ;;  %vm830_vm5 = vweird.f32 %v824_v26 }
 0x3cd   : > { %v837_v36 = vor.u32 1.1754944e-38, %v836_v32  ;;  %vm835_vm7 = vcmp.eq.f32.partialorder %v834_v34, 8.507059e+37 }
 0x3d1   : > { %v1028_v28 = vpop.eup %1027 }
 0x3d2   : > { %v826_v30 = vmul.f32 %v1028_v28, %v824_v26  ;;  %vm831_vm3 = vweird.f32 %v1028_v28 }
 0x3d3   : > { %vm832_vm6 = vmor %vm830_vm5, %vm831_vm3 }
 0x3d4   : > { %v827_v31 = vsub.f32 1.0, %v826_v30 }
 0x3d6   : > { %v828_v33 = vmul.f32 %v1028_v28, %v827_v31 }
 0x3d8   : > { %v829_v35 = vadd.f32 %v1028_v28, %v828_v33 }
 0x3da   : > { %v833_v37 = vsel %vm832_vm6, %v1028_v28, %v829_v35 }
 0x3db   : > { %v838_v38 = vsel %vm835_vm7, %v837_v36, %v833_v37 }
 0x3dc   : > { %v840_v39 = vsel %vm820_vm4, %v838_v38, %v815_v22 }
 0x3dd   : > { %841 = vst [vmem:[%s465_s20] sm:$0xff] %v840_v39 }
 0x3de PF: > { %s24_s29 = sadd.s32 1, %s1035_s29  }
 0x3df   : > { %p21_p4 = scmp.ge.s32.totalorder %s24_s29, 4  }
 0x3e1   :  { %23 = sbr.rel (!%p21_p4) target bundleno = 1 (0x1), region = 106 }

</bundles_post_ra>
